<compile_context>
chip_gen: v7x
topology: tpu7x:2x2x1
jax: 0.10.0
libtpu: 0.0.40
codegen_flags: <defaults>
</compile_context>

<pallas_src>
import functools

import jax
import jax.numpy as jnp
from jax.experimental import pallas as pl
from jax.experimental.pallas import tpu as pltpu

_NEG_INF = -1e30  # pad-row bias -> exp() underflows to exactly 0


def _num_tensorcores() -> int:
    """2 on v7x (two TensorCores per chip), 1 on earlier TPU generations."""
    try:
        kind = jax.devices()[0].device_kind.lower().replace(" ", "")
    except Exception:  # pragma: no cover
        return 1
    return 2 if ("v7" in kind or "7x" in kind) else 1


def _reinforce_kernel(x_ref, u_ref, w1_ref, b1_ref, w2_ref, b2_ref,
                      probs_ref, act_ref, *, n_actions):
    # ---- policy network: Linear -> ReLU -> Linear -> Softmax (transposed) ----
    x = x_ref[...]                                                    # (D, TB)
    h = jnp.dot(w1_ref[...], x, preferred_element_type=jnp.float32)   # (H, TB)
    h = jnp.maximum(h + b1_ref[...], 0.0)
    # w2/b2 rows are padded to 8 actions; pad rows carry bias -1e30.
    logits = jnp.dot(w2_ref[...], h, preferred_element_type=jnp.float32)
    logits = logits + b2_ref[...]                                     # (A8, TB)

    m = jnp.max(logits, axis=0, keepdims=True)                        # (1, TB)
    e = jnp.exp(logits - m)                                           # pad rows -> 0
    s = jnp.sum(e, axis=0, keepdims=True)                             # (1, TB)
    probs = e * pl.reciprocal(s, approx=True)                         # rows ~sum to 1
    probs_ref[...] = probs                                            # lane-dense (A8, TB) store

    # ---- Categorical(probs).sample() via inverse CDF ----
    # Unrolled prefix sum over the A action rows; every intermediate is a
    # full-lane-width (1, TB) row (no narrow vectors, no cross-lane moves).
    u = u_ref[...]                                                    # (1, TB)
    cdf = jnp.zeros_like(u)
    cnt = jnp.zeros_like(u)
    for k in range(n_actions):                                        # A is tiny; unrolled
        cdf = cdf + probs[k:k + 1, :]                                 # static sublane slice
        cnt = cnt + (cdf < u).astype(jnp.float32)
    # Clamp guards float drift at the last CDF boundary.
    act_ref[...] = jnp.minimum(cnt, n_actions - 1).astype(jnp.int32)  # (1, TB)


def reinforce_forward(x, u, w1, b1, w2, b2, *, max_block_b=4096):
    """Batched REINFORCE forward pass.

    x : (B, obs_dim) f32 observations
    u : (B,) or (B,1) f32 uniform draws in [0, 1) (one per observation)
    w1: (obs_dim, hidden),   b1: (1, hidden)
    w2: (hidden, n_actions), b2: (1, n_actions)

    Returns (probs (B, n_actions) f32, actions (B,) int32).
    """
    B, D = x.shape
    H = w1.shape[1]
    A = w2.shape[1]
    a_pad = max(8, pl.cdiv(A, 8) * 8)          # sublane-aligned action head

    # Transposed, sublane-padded parameters; pad rows get prob exactly 0.
    w1_t = w1.T                                                       # (H, D)
    b1_t = b1.T                                                       # (H, 1)
    w2_t = jnp.pad(w2.T, ((0, a_pad - A), (0, 0)))                    # (A8, H)
    b2_t = jnp.pad(b2.T, ((0, a_pad - A), (0, 0)),
                   constant_values=_NEG_INF)                          # (A8, 1)

    # Batch on the lane axis: one tile per TensorCore when everything fits.
    n_cores = _num_tensorcores()
    tb = pl.cdiv(pl.cdiv(B, n_cores), 128) * 128
    tb = max(128, min(tb, (max_block_b // 128) * 128))
    n_tiles = pl.cdiv(B, tb)
    if n_tiles % n_cores:
        n_tiles += n_cores - (n_tiles % n_cores)   # even split across the TCs
    bp = n_tiles * tb

    x_t = jnp.pad(x.T, ((0, 0), (0, bp - B)))                         # (D, bp)
    u_t = jnp.pad(jnp.reshape(u, (1, -1)), ((0, 0), (0, bp - B)))     # (1, bp)

    kernel = functools.partial(_reinforce_kernel, n_actions=A)

    probs_t, act = pl.pallas_call(
        kernel,
        out_shape=(
            jax.ShapeDtypeStruct((a_pad, bp), jnp.float32),
            jax.ShapeDtypeStruct((1, bp), jnp.int32),
        ),
        grid=(n_tiles,),
        in_specs=[
            pl.BlockSpec((D, tb), lambda i: (0, i)),      # x^T : batch on lanes
            pl.BlockSpec((1, tb), lambda i: (0, i)),      # u   : lane-dense row
            pl.BlockSpec((H, D), lambda i: (0, 0)),       # w1^T: VMEM-resident
            pl.BlockSpec((H, 1), lambda i: (0, 0)),       # b1^T: VMEM-resident
            pl.BlockSpec((a_pad, H), lambda i: (0, 0)),   # w2^T (padded): resident
            pl.BlockSpec((a_pad, 1), lambda i: (0, 0)),   # b2^T (padded, -1e30)
        ],
        out_specs=(
            pl.BlockSpec((a_pad, tb), lambda i: (0, i)),  # probs^T slab
            pl.BlockSpec((1, tb), lambda i: (0, i)),      # sampled actions row
        ),
        compiler_params=pltpu.CompilerParams(
            dimension_semantics=("parallel",),            # v7x: shard batch over both TCs
        ),
    )(x_t, u_t, w1_t, b1_t, w2_t, b2_t)

    return probs_t[:A, :B].T, act[0, :B]


if __name__ == "__main__":
    obs_dim, hidden, n_actions = 8, 32, 4
    batch = 512  # batch of observations

    key = jax.random.PRNGKey(0)
    k_x, k_w1, k_b1, k_w2, k_b2, k_u = jax.random.split(key, 6)

    # Deterministic synthetic parameters (no checkpoint load).
    w1 = jax.random.normal(k_w1, (obs_dim, hidden), jnp.float32) * 0.1
    b1 = jax.random.normal(k_b1, (1, hidden), jnp.float32) * 0.01
    w2 = jax.random.normal(k_w2, (hidden, n_actions), jnp.float32) * 0.1
    b2 = jax.random.normal(k_b2, (1, n_actions), jnp.float32) * 0.01

    x = jax.random.normal(k_x, (batch, obs_dim), jnp.float32)
    # Uniform draws consumed by Categorical.sample() (one per observation).
    u = jax.random.uniform(k_u, (batch,), jnp.float32)

    probs, actions = reinforce_forward(x, u, w1, b1, w2, b2)
    jax.block_until_ready((probs, actions))

    # ---- pure-JAX reference ----
    h_ref = jnp.maximum(x @ w1 + b1, 0.0)
    logits_ref = h_ref @ w2 + b2
    ref_probs = jax.nn.softmax(logits_ref, axis=-1)
    ref_cdf = jnp.cumsum(ref_probs, axis=-1)
    ref_actions = jnp.minimum(
        jnp.sum((ref_cdf < u[:, None]).astype(jnp.int32), axis=-1), n_actions - 1)

    assert probs.shape == (batch, n_actions)
    assert actions.shape == (batch,)
    assert bool(jnp.all(jnp.isfinite(probs)))
    # approx reciprocal (EUP) => rows sum to 1 only to ~1e-3; tolerances relaxed.
    assert bool(jnp.allclose(jnp.sum(probs, axis=-1), 1.0, atol=1e-2))
    assert bool(jnp.allclose(probs, ref_probs, atol=1e-2))
    assert bool(jnp.all((actions >= 0) & (actions < n_actions)))
    # Actions must match the reference except (possibly) at rows where u lands
    # within matmul/recip-precision distance of a CDF boundary.
    near_boundary = jnp.min(jnp.abs(ref_cdf - u[:, None]), axis=-1) < 3e-2
    assert bool(jnp.all((actions == ref_actions) | near_boundary))

    print("KERNEL_OK")
</pallas_src>

<mosaic_0001>
module attributes {stable_mosaic.version = 11 : i64} {
  func.func @_reinforce_kernel(%arg0: i32, %arg1: memref<8x512xf32, #tpu.memory_space<vmem>>, %arg2: memref<1x512xf32, #tpu.memory_space<vmem>>, %arg3: memref<32x8xf32, #tpu.memory_space<vmem>>, %arg4: memref<32x1xf32, #tpu.memory_space<vmem>>, %arg5: memref<8x32xf32, #tpu.memory_space<vmem>>, %arg6: memref<8x1xf32, #tpu.memory_space<vmem>>, %arg7: memref<8x512xf32, #tpu.memory_space<vmem>>, %arg8: memref<1x512xi32, #tpu.memory_space<vmem>>) attributes {dimension_semantics = [#tpu.dimension_semantics<parallel>], iteration_bounds = array<i64: 1>, scalar_prefetch = 0 : i64, scratch_operands = 0 : i64, tpu.core_type = #tpu.core_type<tc>, window_params = [{transform_indices = @transform_0, window_bounds = array<i64: 8, 512>}, {transform_indices = @transform_1, window_bounds = array<i64: 1, 512>}, {pipeline_mode = #tpu.pipeline_mode<synchronous>, transform_indices = @transform_2, window_bounds = array<i64: 32, 8>}, {pipeline_mode = #tpu.pipeline_mode<synchronous>, transform_indices = @transform_3, window_bounds = array<i64: 32, 1>}, {pipeline_mode = #tpu.pipeline_mode<synchronous>, transform_indices = @transform_4, window_bounds = array<i64: 8, 32>}, {pipeline_mode = #tpu.pipeline_mode<synchronous>, transform_indices = @transform_5, window_bounds = array<i64: 8, 1>}, {transform_indices = @transform_6, window_bounds = array<i64: 8, 512>}, {transform_indices = @transform_7, window_bounds = array<i64: 1, 512>}]} {
    %c0 = arith.constant 0 : index
    %c0_0 = arith.constant 0 : index
    %0 = vector.load %arg1[%c0, %c0_0] : memref<8x512xf32, #tpu.memory_space<vmem>>, vector<8x512xf32>
    %c0_1 = arith.constant 0 : index
    %c0_2 = arith.constant 0 : index
    %1 = vector.load %arg3[%c0_1, %c0_2] : memref<32x8xf32, #tpu.memory_space<vmem>>, vector<32x8xf32>
    %cst = arith.constant dense<0.000000e+00> : vector<32x512xf32>
    %2 = tpu.matmul %1, %0, %cst {dimension_numbers = #tpu.dot_dimension_numbers<[1], [0], [0], [1], [0, 0, 1, 1], [], []>} : vector<32x8xf32>, vector<8x512xf32>, vector<32x512xf32> -> vector<32x512xf32>
    %c0_3 = arith.constant 0 : index
    %c0_4 = arith.constant 0 : index
    %3 = vector.load %arg4[%c0_3, %c0_4] : memref<32x1xf32, #tpu.memory_space<vmem>>, vector<32x1xf32>
    %4 = vector.broadcast %3 : vector<32x1xf32> to vector<32x512xf32>
    %5 = arith.addf %2, %4 : vector<32x512xf32>
    %cst_5 = arith.constant 0.000000e+00 : f32
    %6 = vector.broadcast %cst_5 : f32 to vector<32x512xf32>
    %7 = arith.maximumf %5, %6 : vector<32x512xf32>
    %c0_6 = arith.constant 0 : index
    %c0_7 = arith.constant 0 : index
    %8 = vector.load %arg5[%c0_6, %c0_7] : memref<8x32xf32, #tpu.memory_space<vmem>>, vector<8x32xf32>
    %cst_8 = arith.constant dense<0.000000e+00> : vector<8x512xf32>
    %9 = tpu.matmul %8, %7, %cst_8 {dimension_numbers = #tpu.dot_dimension_numbers<[1], [0], [0], [1], [0, 0, 1, 1], [], []>} : vector<8x32xf32>, vector<32x512xf32>, vector<8x512xf32> -> vector<8x512xf32>
    %c0_9 = arith.constant 0 : index
    %c0_10 = arith.constant 0 : index
    %10 = vector.load %arg6[%c0_9, %c0_10] : memref<8x1xf32, #tpu.memory_space<vmem>>, vector<8x1xf32>
    %11 = vector.broadcast %10 : vector<8x1xf32> to vector<8x512xf32>
    %12 = arith.addf %9, %11 : vector<8x512xf32>
    %cst_11 = arith.constant dense<0xFF800000> : vector<512xf32>
    %13 = vector.multi_reduction <maximumf>, %12, %cst_11 [0] : vector<8x512xf32> to vector<512xf32>
    %14 = vector.shape_cast %13 : vector<512xf32> to vector<1x512xf32>
    %15 = vector.broadcast %14 : vector<1x512xf32> to vector<8x512xf32>
    %16 = arith.subf %12, %15 : vector<8x512xf32>
    %17 = math.exp %16 : vector<8x512xf32>
    %cst_12 = arith.constant dense<0.000000e+00> : vector<512xf32>
    %18 = vector.multi_reduction <add>, %17, %cst_12 [0] : vector<8x512xf32> to vector<512xf32>
    %19 = vector.shape_cast %18 : vector<512xf32> to vector<1x512xf32>
    %20 = tpu.reciprocal %19 {approx = true} : vector<1x512xf32> -> vector<1x512xf32>
    %21 = vector.broadcast %20 : vector<1x512xf32> to vector<8x512xf32>
    %22 = arith.mulf %17, %21 : vector<8x512xf32>
    %c0_13 = arith.constant 0 : index
    %c0_14 = arith.constant 0 : index
    %23 = vector.load %arg7[%c0_13, %c0_14] : memref<8x512xf32, #tpu.memory_space<vmem>>, vector<8x512xf32>
    tpu.vector_store %arg7[%c0_13, %c0_14], %22 {strides = array<i32>} : memref<8x512xf32, #tpu.memory_space<vmem>>, vector<8x512xf32>,
    %c0_15 = arith.constant 0 : index
    %c0_16 = arith.constant 0 : index
    %24 = vector.load %arg2[%c0_15, %c0_16] : memref<1x512xf32, #tpu.memory_space<vmem>>, vector<1x512xf32>
    %cst_17 = arith.constant 0.000000e+00 : f32
    %25 = vector.broadcast %cst_17 : f32 to vector<1x512xf32>
    %cst_18 = arith.constant 0.000000e+00 : f32
    %26 = vector.broadcast %cst_18 : f32 to vector<1x512xf32>
    %27 = vector.extract_strided_slice %22 {offsets = [0, 0], sizes = [1, 512], strides = [1, 1]} : vector<8x512xf32> to vector<1x512xf32>
    %28 = arith.addf %25, %27 : vector<1x512xf32>
    %29 = arith.cmpf olt, %28, %24 : vector<1x512xf32>
    %30 = arith.extui %29 : vector<1x512xi1> to vector<1x512xi32>
    %31 = arith.sitofp %30 : vector<1x512xi32> to vector<1x512xf32>
    %32 = arith.addf %26, %31 : vector<1x512xf32>
    %33 = vector.extract_strided_slice %22 {offsets = [1, 0], sizes = [1, 512], strides = [1, 1]} : vector<8x512xf32> to vector<1x512xf32>
    %34 = arith.addf %28, %33 : vector<1x512xf32>
    %35 = arith.cmpf olt, %34, %24 : vector<1x512xf32>
    %36 = arith.extui %35 : vector<1x512xi1> to vector<1x512xi32>
    %37 = arith.sitofp %36 : vector<1x512xi32> to vector<1x512xf32>
    %38 = arith.addf %32, %37 : vector<1x512xf32>
    %39 = vector.extract_strided_slice %22 {offsets = [2, 0], sizes = [1, 512], strides = [1, 1]} : vector<8x512xf32> to vector<1x512xf32>
    %40 = arith.addf %34, %39 : vector<1x512xf32>
    %41 = arith.cmpf olt, %40, %24 : vector<1x512xf32>
    %42 = arith.extui %41 : vector<1x512xi1> to vector<1x512xi32>
    %43 = arith.sitofp %42 : vector<1x512xi32> to vector<1x512xf32>
    %44 = arith.addf %38, %43 : vector<1x512xf32>
    %45 = vector.extract_strided_slice %22 {offsets = [3, 0], sizes = [1, 512], strides = [1, 1]} : vector<8x512xf32> to vector<1x512xf32>
    %46 = arith.addf %40, %45 : vector<1x512xf32>
    %47 = arith.cmpf olt, %46, %24 : vector<1x512xf32>
    %48 = arith.extui %47 : vector<1x512xi1> to vector<1x512xi32>
    %49 = arith.sitofp %48 : vector<1x512xi32> to vector<1x512xf32>
    %50 = arith.addf %44, %49 : vector<1x512xf32>
    %cst_19 = arith.constant 3.000000e+00 : f32
    %51 = vector.broadcast %cst_19 : f32 to vector<1x512xf32>
    %52 = arith.minimumf %50, %51 : vector<1x512xf32>
    %53 = arith.fptosi %52 : vector<1x512xf32> to vector<1x512xi32>
    %c0_20 = arith.constant 0 : index
    %c0_21 = arith.constant 0 : index
    %54 = vector.load %arg8[%c0_20, %c0_21] : memref<1x512xi32, #tpu.memory_space<vmem>>, vector<1x512xi32>
    tpu.vector_store %arg8[%c0_20, %c0_21], %53 {strides = array<i32>} : memref<1x512xi32, #tpu.memory_space<vmem>>, vector<1x512xi32>,
    return
  }
  func.func @transform_0(%arg0: i32) -> (i32, i32) {
    %c0_i32 = arith.constant 0 : i32
    %c0_i32_0 = arith.constant 0 : i32
    return %c0_i32, %arg0 : i32, i32
  }
  func.func @transform_1(%arg0: i32) -> (i32, i32) {
    %c0_i32 = arith.constant 0 : i32
    %c0_i32_0 = arith.constant 0 : i32
    return %c0_i32, %arg0 : i32, i32
  }
  func.func @transform_2(%arg0: i32) -> (i32, i32) {
    %c0_i32 = arith.constant 0 : i32
    %c0_i32_0 = arith.constant 0 : i32
    %c0_i32_1 = arith.constant 0 : i32
    return %c0_i32, %c0_i32_0 : i32, i32
  }
  func.func @transform_3(%arg0: i32) -> (i32, i32) {
    %c0_i32 = arith.constant 0 : i32
    %c0_i32_0 = arith.constant 0 : i32
    %c0_i32_1 = arith.constant 0 : i32
    return %c0_i32, %c0_i32_0 : i32, i32
  }
  func.func @transform_4(%arg0: i32) -> (i32, i32) {
    %c0_i32 = arith.constant 0 : i32
    %c0_i32_0 = arith.constant 0 : i32
    %c0_i32_1 = arith.constant 0 : i32
    return %c0_i32, %c0_i32_0 : i32, i32
  }
  func.func @transform_5(%arg0: i32) -> (i32, i32) {
    %c0_i32 = arith.constant 0 : i32
    %c0_i32_0 = arith.constant 0 : i32
    %c0_i32_1 = arith.constant 0 : i32
    return %c0_i32, %c0_i32_0 : i32, i32
  }
  func.func @transform_6(%arg0: i32) -> (i32, i32) {
    %c0_i32 = arith.constant 0 : i32
    %c0_i32_0 = arith.constant 0 : i32
    return %c0_i32, %arg0 : i32, i32
  }
  func.func @transform_7(%arg0: i32) -> (i32, i32) {
    %c0_i32 = arith.constant 0 : i32
    %c0_i32_0 = arith.constant 0 : i32
    return %c0_i32, %arg0 : i32, i32
  }
}

</mosaic_0001>

<bundles_post_ra>
// kernel: tpu_custom_call.1
= control target key start
LH: loop header
LB: loop body
LE: loop exit
PB: predicated region body
PF: predicated region fallthrough
CT: control target
= control target key end

     0   :  { %13 = vsyncpa [#allocation3], 0  ;;  %vm59_vm0 = vcmask 64512   ;;  %v807_v5 = vmov 0.0   ;;  %s1026_s0 = inlined_call_operand.vmem [shape: f32[8,512], index: 0, kind: input, shape index: {}]   ;;  %s1027_s1 = inlined_call_operand.vmem [shape: f32[1,512], index: 1, kind: input, shape index: {}]   ;;  %s1028_s2 = inlined_call_operand.vmem [shape: f32[32,8], index: 2, kind: input, shape index: {}]   ;;  %s1029_s3 = inlined_call_operand.vmem [shape: f32[32,1], index: 3, kind: input, shape index: {}]   ;;  %s1030_s4 = inlined_call_operand.vmem [shape: f32[8,32], index: 4, kind: input, shape index: {}]   ;;  %s1031_s5 = inlined_call_operand.vmem [shape: f32[8,1], index: 5, kind: input, shape index: {}]   ;;  %s1032_s6 = inlined_call_operand.hbm [shape: f32[8,512], index: 6, kind: output, shape index: {0}]   ;;  %s1033_s7 = inlined_call_operand.hbm [shape: s32[1,512], index: 7, kind: output, shape index: {1}]  }
   0x1   :  { %v28_v0 = vld [vmem:[%s1026_s0 + $0x8] sm:$0xff]  ;;  %v30_v1 = vld [vmem:[%s1026_s0 + $0x18] sm:$0xff]  ;;  %v27_v2 = vld [vmem:[%s1026_s0] sm:$0xff]  ;;  %136 = vmatprep.mubr.f32.mxu0 %v807_v5  ;;  %225 = vmatprep.mubr.f32.mxu1 %v807_v5 }
   0x2   :  { %72 = vmatprep.subr.mxu0 %v28_v0  ;;  %161 = vmatprep.subr.mxu1 %v30_v1  ;;  %v29_v3 = vld [vmem:[%s1026_s0 + $0x10] sm:$0xff]  ;;  %v31_v4 = vld [vmem:[%s1028_s2] sm:$0xff] }
   0x3   :  { %73 = vmatpush1.msra.mxu0 %v27_v2  ;;  %162 = vmatpush1.msra.mxu1 %v29_v3  ;;  %v35_v6 = vld [vmem:[%s1029_s3] sm:$0xff]  ;;  %v37_v7 = vld [vmem:[%s1029_s3 + $0x10] sm:$0xff] }
   0x4   :  { %686 = vmatmul.mubr.msk.f32.vlgmr.msra.gmra.mrb[0].mxu0 %vm59_vm0, %v31_v4  ;;  %690 = vmatmul.mubr.msk.f32.vlgmr.msra.gmra.mrb[0].mxu1 %vm59_vm0, %v31_v4 }
   0x5   :  { %14 = vsyncpa [#allocation5], 0  ;;  %142 = vmatprep.mubr.f32.mxu0 %v807_v5  ;;  %231 = vmatprep.mubr.f32.mxu1 %v807_v5  ;;  %v32_v8 = vld [vmem:[%s1028_s2 + $0x8] sm:$0xff]  ;;  %v808_v9 = vmov 0   ;;  %v38_v11 = vld [vmem:[%s1029_s3 + $0x18] sm:$0xff]  ;;  %vm273_vm1 = vcmask 261120  }
   0x6   :  { %741 = vset.pattern.permute.xlu0 %v808_v9  ;;  %742 = vset.pattern.permute.xlu1 %v808_v9  ;;  %v36_v10 = vld [vmem:[%s1029_s3 + $0x8] sm:$0xff]  ;;  %v33_v12 = vld [vmem:[%s1028_s2 + $0x10] sm:$0xff]  ;;  %v267_v13 = vld [vmem:[%s1031_s5] sm:$0xff]  ;;  %s809_s26 = smov [#allocation2]  }
   0x7   :  { %41 = vperm.xlu0 %741, %v35_v6   ;;  %51 = vperm.xlu1 %742, %v37_v7   ;;  %v34_v14 = vld [vmem:[%s1028_s2 + $0x18] sm:$0xff]  ;;  %s664_s27 = sshll.u32 %s809_s26, 4  ;;  %s665_s27 = int_to_ptr.vmem [resolvable:$true] %s664_s27 }
   0x8   :  { %687 = vmatmul.mubr.msk.f32.gmra.mrb[2].mxu0 %vm59_vm0, %v32_v8  ;;  %691 = vmatmul.mubr.msk.f32.gmra.mrb[2].mxu1 %vm59_vm0, %v32_v8  ;;  %p764_p1 = scmp.lt.s32.totalorder %s665_s27, %s665_s27 }
   0x9   :  { %148 = vmatprep.mubr.f32.mxu0 %v807_v5  ;;  %237 = vmatprep.mubr.f32.mxu1 %v807_v5 }
   0xb   :  { %46 = vperm.xlu0 %741, %v36_v10   ;;  %56 = vperm.xlu1 %742, %v38_v11  }
   0xc   :  { %688 = vmatmul.mubr.msk.f32.gmra.mrb[4].mxu0 %vm59_vm0, %v33_v12  ;;  %692 = vmatmul.mubr.msk.f32.gmra.mrb[4].mxu1 %vm59_vm0, %v33_v12  ;;  %v266_v12 = vld [vmem:[%s1030_s4] sm:$0xff] }
   0xd   :  { %154 = vmatprep.mubr.f32.mxu0 %v807_v5  ;;  %243 = vmatprep.mubr.f32.mxu1 %v807_v5 }
   0xf   :  { %270 = vperm.xlu0 %741, %v267_v13  }
  0x10   :  { %689 = vmatmul.mubr.msk.f32.gmra.mrb[6].mxu0 %vm59_vm0, %v34_v14  ;;  %693 = vmatmul.mubr.msk.f32.gmra.mrb[6].mxu1 %vm59_vm0, %v34_v14 }
  0x11   :  { %341 = vmatprep.mubr.f32.mxu0 %v807_v5  ;;  %412 = vmatprep.mubr.f32.mxu1 %v807_v5 }
  0x86   :  { %v42_v15 = vpop.permute.xlu0 %41  ;;  %v52_v23 = vpop.permute.xlu1 %51 }
  0x8a   :  { %v47_v20 = vpop.permute.xlu0 %46  ;;  %v57_v52 = vpop.permute.xlu1 %56 }
  0x8e   :  { %v271_v13 = vpop.permute.xlu0 %270 }
  0xd7   :  { %v138_v16 = vpop.f32.mrb[0].mxu0  ;;  %v227_v17 = vpop.f32.mrb[0].mxu1 }
  0xd8   :  { %v140_v18 = vpop.f32.mrb[1].mxu0  ;;  %v229_v19 = vpop.f32.mrb[1].mxu1  ;;  %v139_v21 = vadd.f32 %v138_v16, %v42_v15  ;;  %v228_v22 = vadd.f32 %v227_v17, %v42_v15 }
  0xd9   :  { %v141_v24 = vadd.f32 %v140_v18, %v42_v15  ;;  %v230_v25 = vadd.f32 %v229_v19, %v42_v15 }
  0xda   :  { %v250_v34 = vmax.f32 %v139_v21, 0.0  ;;  %v252_v35 = vmax.f32 %v228_v22, 0.0 }
  0xdb   :  { %v144_v26 = vpop.f32.mrb[2].mxu0  ;;  %v233_v27 = vpop.f32.mrb[2].mxu1  ;;  %v251_v38 = vmax.f32 %v141_v24, 0.0  ;;  %v253_v39 = vmax.f32 %v230_v25, 0.0 }
  0xdc   :  { %v145_v28 = vadd.f32 %v144_v26, %v47_v20  ;;  %v234_v29 = vadd.f32 %v233_v27, %v47_v20  ;;  %v146_v30 = vpop.f32.mrb[3].mxu0  ;;  %v235_v31 = vpop.f32.mrb[3].mxu1 }
  0xdd   :  { %v147_v32 = vadd.f32 %v146_v30, %v47_v20  ;;  %v236_v33 = vadd.f32 %v235_v31, %v47_v20 }
  0xde   :  { %v254_v36 = vmax.f32 %v145_v28, 0.0  ;;  %v256_v37 = vmax.f32 %v234_v29, 0.0 }
  0xdf   :  { %v255_v40 = vmax.f32 %v147_v32, 0.0  ;;  %v257_v41 = vmax.f32 %v236_v33, 0.0  ;;  %v150_v42 = vpop.f32.mrb[4].mxu0  ;;  %v239_v43 = vpop.f32.mrb[4].mxu1 }
  0xe0   :  { %v714_v44 = vpack.c.bf16 %v254_v36, %v250_v34  ;;  %v722_v45 = vpack.c.bf16 %v256_v37, %v252_v35  ;;  %v152_v46 = vpop.f32.mrb[5].mxu0  ;;  %v241_v47 = vpop.f32.mrb[5].mxu1  ;;  %v151_v50 = vadd.f32 %v150_v42, %v52_v23  ;;  %v240_v51 = vadd.f32 %v239_v43, %v52_v23 }
  0xe1   :  { %v712_v48 = vpack.c.bf16 %v255_v40, %v251_v38  ;;  %v720_v49 = vpack.c.bf16 %v257_v41, %v253_v39  ;;  %v153_v53 = vadd.f32 %v152_v46, %v52_v23  ;;  %v242_v54 = vadd.f32 %v241_v47, %v52_v23 }
  0xe2   :  { %v258_v63 = vmax.f32 %v151_v50, 0.0  ;;  %v260_v0 = vmax.f32 %v240_v51, 0.0 }
  0xe3   :  { %v156_v55 = vpop.f32.mrb[6].mxu0  ;;  %v245_v56 = vpop.f32.mrb[6].mxu1  ;;  %713 = vmatprep.subr.bf16.mxu0 %v712_v48  ;;  %721 = vmatprep.subr.bf16.mxu1 %v720_v49  ;;  %v259_v3 = vmax.f32 %v153_v53, 0.0  ;;  %v261_v4 = vmax.f32 %v242_v54, 0.0 }
  0xe4   :  { %v157_v57 = vadd.f32 %v156_v55, %v57_v52  ;;  %v246_v58 = vadd.f32 %v245_v56, %v57_v52  ;;  %v158_v59 = vpop.f32.mrb[7].mxu0  ;;  %v247_v60 = vpop.f32.mrb[7].mxu1  ;;  %715 = vmatpush1.bf16.msra.mxu0 %v714_v44  ;;  %723 = vmatpush1.bf16.msra.mxu1 %v722_v45 }
  0xe5   :  { %v159_v61 = vadd.f32 %v158_v59, %v57_v52  ;;  %v248_v62 = vadd.f32 %v247_v60, %v57_v52 }
  0xe6   :  { %v262_v1 = vmax.f32 %v157_v57, 0.0  ;;  %v264_v2 = vmax.f32 %v246_v58, 0.0 }
  0xe7   :  { %v263_v6 = vmax.f32 %v159_v61, 0.0  ;;  %v265_v7 = vmax.f32 %v248_v62, 0.0 }
  0xe8   :  { %v718_v8 = vpack.c.bf16 %v262_v1, %v258_v63  ;;  %v726_v9 = vpack.c.bf16 %v264_v2, %v260_v0 }
  0xe9   :  { %v716_v10 = vpack.c.bf16 %v263_v6, %v259_v3  ;;  %v724_v11 = vpack.c.bf16 %v265_v7, %v261_v4 }
  0xeb   :  { %717 = vmatprep.subr.bf16.mxu0 %v716_v10  ;;  %725 = vmatprep.subr.bf16.mxu1 %v724_v11 }
  0xec   :  { %719 = vmatpush1.bf16.msra.mxu0 %v718_v8  ;;  %727 = vmatpush1.bf16.msra.mxu1 %v726_v9 }
  0xef   :  { %694 = vmatmul.mubr.msk.f32.vlgmr.msra.gmra.mrb[8].mxu0 %vm273_vm1, %v266_v12  ;;  %695 = vmatmul.mubr.msk.f32.vlgmr.msra.gmra.mrb[8].mxu1 %vm273_vm1, %v266_v12 }
 0x1c2   :  { %v343_v14 = vpop.f32.mrb[8].mxu0  ;;  %v414_v15 = vpop.f32.mrb[8].mxu1 }
 0x1c3   :  { %v344_v16 = vadd.f32 %v343_v14, %v271_v13  ;;  %v415_v17 = vadd.f32 %v414_v15, %v271_v13  ;;  %v345_v18 = vpop.f32.mrb[9].mxu0  ;;  %v416_v19 = vpop.f32.mrb[9].mxu1 }
 0x1c4   :  { %v346_v20 = vadd.f32 %v345_v18, %v271_v13  ;;  %v417_v21 = vadd.f32 %v416_v19, %v271_v13  ;;  %v497_v13 = vlaneseq }
 0x1c5   :  { %v419_v22 = vrot.slane %v344_v16, 4  ;;  %v431_v23 = vrot.slane %v415_v17, 4 }
 0x1c6   :  { %v425_v24 = vrot.slane %v346_v20, 4  ;;  %v437_v25 = vrot.slane %v417_v21, 4 }
 0x1c7   :  { %v420_v26 = vmax.f32 %v344_v16, %v419_v22  ;;  %v432_v27 = vmax.f32 %v415_v17, %v431_v23  ;;  %v491_v22 = vld [vmem:[%s1027_s1] sm:$0xf]  ;;  %s759_s1 = scalar_lea.vmem %s665_s27, 512 }
 0x1c8   :  { %v426_v28 = vmax.f32 %v346_v20, %v425_v24  ;;  %v438_v29 = vmax.f32 %v417_v21, %v437_v25  ;;  %p760_p0 = scmp.ne.s32.totalorder %s665_s27, %s759_s1  ;;  %p765_p2 = scmp.lt.s32.totalorder %s759_s1, %s759_s1 }
 0x1c9   :  { %v421_v30 = vrot.slane %v420_v26, 2  ;;  %v433_v31 = vrot.slane %v432_v27, 2 }
 0x1ca   :  { %v427_v32 = vrot.slane %v426_v28, 2  ;;  %v439_v33 = vrot.slane %v438_v29, 2  ;;  %p766_p3 = por %p765_p2, %p764_p1 }
 0x1cb   :  { %v422_v34 = vmax.f32 %v420_v26, %v421_v30  ;;  %v434_v35 = vmax.f32 %v432_v27, %v433_v31 }
 0x1cc   :  { %v428_v36 = vmax.f32 %v426_v28, %v427_v32  ;;  %v440_v37 = vmax.f32 %v438_v29, %v439_v33  ;;  %p767_p4 = pnand %p766_p3, %p760_p0 }
 0x1cd   :  { %v423_v38 = vrot.slane %v422_v34, 1  ;;  %v435_v39 = vrot.slane %v434_v35, 1 }
 0x1ce   :  { %v429_v40 = vrot.slane %v428_v36, 1  ;;  %v441_v41 = vrot.slane %v440_v37, 1 }
 0x1cf   :  { %v424_v42 = vmax.f32 %v422_v34, %v423_v38  ;;  %v436_v43 = vmax.f32 %v434_v35, %v435_v39 }
 0x1d0   :  { %v430_v44 = vmax.f32 %v428_v36, %v429_v40  ;;  %v442_v45 = vmax.f32 %v440_v37, %v441_v41 }
 0x1d1   :  { %v443_v46 = vsub.f32 %v344_v16, %v424_v42  ;;  %v445_v47 = vsub.f32 %v415_v17, %v436_v43 }
 0x1d2   :  { %v444_v48 = vsub.f32 %v346_v20, %v430_v44  ;;  %v446_v49 = vsub.f32 %v417_v21, %v442_v45  ;;  %v913_v20 = vshrl.u32 %v497_v13, 7 }
 0x1d3   :  { %v447_v50 = vmul.f32 1.442695, %v443_v46  ;;  %v451_v51 = vmul.f32 1.442695, %v445_v47 }
 0x1d4   :  { %v449_v52 = vmul.f32 1.442695, %v444_v48  ;;  %v453_v53 = vmul.f32 1.442695, %v446_v49  ;;  %v499_v21 = vsub.s32 0, %v913_v20  ;;  %v507_v23 = vsub.s32 2, %v913_v20 }
 0x1d5   :  { %743 = vpow2.f32 %v447_v50  ;;  %v503_v24 = vsub.s32 1, %v913_v20  ;;  %v511_v25 = vsub.s32 3, %v913_v20 }
 0x1d6   :  { %745 = vpow2.f32 %v451_v51  ;;  %v922_v26 = vrot.slane %v491_v22, %v499_v21  ;;  %v924_v28 = vrot.slane %v491_v22, %v507_v23 }
 0x1d7   :  { %747 = vpow2.f32 %v449_v52  ;;  %v928_v31 = vrot.slane %v491_v22, %v503_v24  ;;  %v932_v34 = vrot.slane %v491_v22, %v511_v25 }
 0x1d8   :  { %749 = vpow2.f32 %v453_v53 }
 0x1df   :  { %v744_v54 = vpop.eup %743 }
 0x1e0   :  { %v746_v55 = vpop.eup %745  ;;  %v455_v56 = vrot.slane %v744_v54, 4 }
 0x1e1   :  { %v748_v57 = vpop.eup %747  ;;  %v467_v58 = vrot.slane %v746_v55, 4 }
 0x1e2   :  { %v750_v59 = vpop.eup %749  ;;  %v456_v60 = vadd.f32 %v744_v54, %v455_v56  ;;  %v461_v61 = vrot.slane %v748_v57, 4 }
 0x1e3   :  { %v468_v62 = vadd.f32 %v746_v55, %v467_v58  ;;  %v473_v63 = vrot.slane %v750_v59, 4 }
 0x1e4   :  { %v457_v0 = vrot.slane %v456_v60, 2  ;;  %v462_v1 = vadd.f32 %v748_v57, %v461_v61 }
 0x1e5   :  { %v469_v2 = vrot.slane %v468_v62, 2  ;;  %v474_v3 = vadd.f32 %v750_v59, %v473_v63 }
 0x1e6   :  { %v458_v4 = vadd.f32 %v457_v0, %v456_v60  ;;  %v463_v6 = vrot.slane %v462_v1, 2 }
 0x1e7   :  { %v470_v7 = vadd.f32 %v469_v2, %v468_v62  ;;  %v475_v8 = vrot.slane %v474_v3, 2 }
 0x1e8   :  { %v459_v9 = vrot.slane %v458_v4, 1  ;;  %v464_v10 = vadd.f32 %v463_v6, %v462_v1 }
 0x1e9   :  { %v471_v11 = vrot.slane %v470_v7, 1  ;;  %v476_v12 = vadd.f32 %v475_v8, %v474_v3 }
 0x1ea   :  { %v460_v14 = vadd.f32 %v459_v9, %v458_v4  ;;  %v465_v15 = vrot.slane %v464_v10, 1 }
 0x1eb   :  { %v472_v16 = vadd.f32 %v471_v11, %v470_v7  ;;  %v477_v17 = vrot.slane %v476_v12, 1 }
 0x1ec   :  { %v466_v18 = vadd.f32 %v465_v15, %v464_v10  ;;  %751 = vrcp.f32 %v460_v14 }
 0x1ed   :  { %v478_v19 = vadd.f32 %v477_v17, %v476_v12  ;;  %753 = vrcp.f32 %v472_v16 }
 0x1ee   :  { %755 = vrcp.f32 %v466_v18 }
 0x1ef   :  { %757 = vrcp.f32 %v478_v19 }
 0x1f6   :  { %v752_v27 = vpop.eup %751 }
 0x1f7   :  { %v754_v29 = vpop.eup %753  ;;  %v926_v30 = vmul.f32 %v752_v27, %v744_v54 }
 0x1f8   :  { %v756_v32 = vpop.eup %755  ;;  %v930_v33 = vmul.f32 %v754_v29, %v746_v55 }
 0x1f9   :  { %v758_v35 = vpop.eup %757  ;;  %v934_v36 = vmul.f32 %v756_v32, %v748_v57  ;;  %487 = vst [vmem:[#allocation2] sm:$0xff] %v926_v30  ;;  %vm517_vm2 = vcmp.lt.f32.partialorder %v926_v30, %v922_v26  ;;  %v537_v37 = vrot.slane %v926_v30, 1  ;;  %v565_v40 = vrot.slane %v926_v30, 2 }
 0x1fa   :  { %v940_v38 = vmul.f32 %v758_v35, %v750_v59  ;;  %489 = vst [vmem:[#allocation2 + $0x10] sm:$0xff] %v930_v33  ;;  %vm519_vm3 = vcmp.lt.f32.partialorder %v930_v33, %v924_v28  ;;  %v539_v39 = vrot.slane %v930_v33, 1  ;;  %v696_v41 = vsel %vm517_vm2, 1.0, %v807_v5 }
 0x1fb   :  { %488 = vst [vmem:[#allocation2 + $0x8] sm:$0xff] %v934_v36  ;;  %vm518_vm4 = vcmp.lt.f32.partialorder %v934_v36, %v928_v31  ;;  %v538_v42 = vrot.slane %v934_v36, 1  ;;  %v545_v43 = vadd.f32 %v537_v37, %v926_v30  ;;  %v698_v44 = vsel %vm519_vm3, 1.0, %v807_v5 }
 0x1fc   :  { %490 = vst [vmem:[#allocation2 + $0x18] sm:$0xff] %v940_v38  ;;  %vm520_vm5 = vcmp.lt.f32.partialorder %v940_v38, %v932_v34  ;;  %v540_v45 = vrot.slane %v940_v38, 1  ;;  %v547_v46 = vadd.f32 %v539_v39, %v930_v33 }
 0x1fd   :  { %770 = shalt.err (!%p767_p4)
}
 0x1fe   :  { %s771_s30 = scalar_lea.hbm %s1032_s6, 512 }
 0x1ff   :  { %p772_p5 = scmp.ne.s32.totalorder %s1032_s6, %s771_s30  ;;  %p775_p6 = scmp.lt.u32.totalorder %s771_s30, %s1032_s6 }
 0x201   :  { %p777_p7 = pnand %p775_p6, %p772_p5 }
 0x203   :  { %780 = shalt.err (!%p777_p7)
}
 0x204   :  { %667 = dma.vmem_to_hbm [thread:$0]  %s665_s27, 512, %s1032_s6, [#allocation3]   ;;  %v697_v47 = vsel %vm518_vm4, 1.0, %v807_v5  ;;  %v699_v48 = vsel %vm520_vm5, 1.0, %v807_v5  ;;  %v546_v49 = vadd.f32 %v538_v42, %v934_v36  ;;  %vm549_vm6 = vcmp.lt.f32.partialorder %v545_v43, %v922_v26 }
 0x205   :  { %v548_v50 = vadd.f32 %v540_v45, %v940_v38  ;;  %vm551_vm7 = vcmp.lt.f32.partialorder %v547_v46, %v924_v28  ;;  %v700_v51 = vsel %vm549_vm6, 1.0, %v807_v5  ;;  %v566_v52 = vrot.slane %v934_v36, 2  ;;  %s811_s6 = smov [#allocation4]  }
 0x206   :  { %vm550_vm8 = vcmp.lt.f32.partialorder %v546_v49, %v928_v31  ;;  %v702_v53 = vsel %vm551_vm7, 1.0, %v807_v5  ;;  %v561_v54 = vadd.f32 %v700_v51, %v696_v41  ;;  %v567_v55 = vrot.slane %v930_v33, 2  ;;  %s674_s13 = sshll.u32 %s811_s6, 4  ;;  %s675_s13 = int_to_ptr.vmem [resolvable:$true] %s674_s13 }
 0x207   :  { %vm552_vm9 = vcmp.lt.f32.partialorder %v548_v50, %v932_v34  ;;  %v701_v56 = vsel %vm550_vm8, 1.0, %v807_v5  ;;  %v568_v57 = vrot.slane %v940_v38, 2  ;;  %v573_v58 = vadd.f32 %v565_v40, %v545_v43  ;;  %s781_s14 = scalar_lea.vmem %s675_s13, 64  ;;  %p786_p9 = scmp.lt.s32.totalorder %s675_s13, %s675_s13 }
 0x208   :  { %v703_v59 = vsel %vm552_vm9, 1.0, %v807_v5  ;;  %v563_v60 = vadd.f32 %v702_v53, %v698_v44  ;;  %v574_v61 = vadd.f32 %v566_v52, %v546_v49  ;;  %v575_v62 = vadd.f32 %v567_v55, %v547_v46  ;;  %p782_p8 = scmp.ne.s32.totalorder %s675_s13, %s781_s14  ;;  %p787_p10 = scmp.lt.s32.totalorder %s781_s14, %s781_s14 }
 0x209   :  { %v562_v63 = vadd.f32 %v701_v56, %v697_v47  ;;  %v564_v0 = vadd.f32 %v703_v59, %v699_v48  ;;  %v576_v1 = vadd.f32 %v568_v57, %v548_v50  ;;  %vm577_vm10 = vcmp.lt.f32.partialorder %v573_v58, %v922_v26 }
 0x20a   :  { %vm578_vm11 = vcmp.lt.f32.partialorder %v574_v61, %v928_v31  ;;  %vm579_vm12 = vcmp.lt.f32.partialorder %v575_v62, %v924_v28  ;;  %v704_v2 = vsel %vm577_vm10, 1.0, %v807_v5  ;;  %v593_v3 = vrot.slane %v926_v30, 3  ;;  %p788_p11 = por %p787_p10, %p786_p9 }
 0x20b   :  { %vm580_vm13 = vcmp.lt.f32.partialorder %v576_v1, %v932_v34  ;;  %v705_v4 = vsel %vm578_vm11, 1.0, %v807_v5  ;;  %v706_v6 = vsel %vm579_vm12, 1.0, %v807_v5  ;;  %v594_v7 = vrot.slane %v934_v36, 3 }
 0x20c   :  { %v707_v8 = vsel %vm580_vm13, 1.0, %v807_v5  ;;  %v589_v9 = vadd.f32 %v704_v2, %v561_v54  ;;  %v595_v10 = vrot.slane %v930_v33, 3  ;;  %v590_v11 = vadd.f32 %v705_v4, %v562_v63  ;;  %p789_p12 = pnand %p788_p11, %p782_p8 }
 0x20d   :  { %v596_v12 = vrot.slane %v940_v38, 3  ;;  %v601_v14 = vadd.f32 %v593_v3, %v573_v58  ;;  %v602_v15 = vadd.f32 %v594_v7, %v574_v61  ;;  %v591_v16 = vadd.f32 %v706_v6, %v563_v60 }
 0x20e   :  { %v603_v17 = vadd.f32 %v595_v10, %v575_v62  ;;  %v810_v18 = vmov 1966171168   ;;  %v592_v21 = vadd.f32 %v707_v8, %v564_v0  ;;  %vm655_vm2 = vcmp.lt.s32.totalorder %v497_v13, 512 }
 0x20f   :  { %v632_v19 = vunpack.c.l.s4 %v810_v18  ;;  %v604_v22 = vadd.f32 %v596_v12, %v576_v1  ;;  %vm605_vm14 = vcmp.lt.f32.partialorder %v601_v14, %v922_v26  ;;  %vm606_vm15 = vcmp.lt.f32.partialorder %v602_v15, %v928_v31 }
 0x210   :  { %vm607_vm0 = vcmp.lt.f32.partialorder %v603_v17, %v924_v28  ;;  %v708_v23 = vsel %vm605_vm14, 1.0, %v807_v5  ;;  %v709_v24 = vsel %vm606_vm15, 1.0, %v807_v5 }
 0x211   :  { %vm608_vm1 = vcmp.lt.f32.partialorder %v604_v22, %v932_v34  ;;  %v710_v25 = vsel %vm607_vm0, 1.0, %v807_v5  ;;  %v617_v27 = vadd.f32 %v708_v23, %v589_v9  ;;  %v618_v29 = vadd.f32 %v709_v24, %v590_v11 }
 0x212   :  { %v711_v30 = vsel %vm608_vm1, 1.0, %v807_v5  ;;  %v619_v32 = vadd.f32 %v710_v25, %v591_v16  ;;  %v633_v36 = vunpack.c.0.s8 %v632_v19 }
 0x213   :  { %v620_v33 = vadd.f32 %v711_v30, %v592_v21  ;;  %v621_v35 = vmin.f32 %v617_v27, 3.0  ;;  %v622_v26 = vmin.f32 %v618_v29, 3.0 }
 0x214   :  { %v623_v31 = vmin.f32 %v619_v32, 3.0  ;;  %v636_v34 = vsub.s32 %v633_v36, %v913_v20 }
 0x215   :  { %v624_v37 = vmin.f32 %v620_v33, 3.0  ;;  %v728_v28 = vtrunc.f32 %v621_v35  ;;  %v730_v38 = vtrunc.f32 %v622_v26 }
 0x216   :  { %v732_v39 = vtrunc.f32 %v623_v31 }
 0x217   :  { %v729_v40 = vcvt.f32.s32 %v728_v28  ;;  %v731_v41 = vcvt.f32.s32 %v730_v38  ;;  %v734_v42 = vtrunc.f32 %v624_v37 }
 0x218   :  { %v733_v43 = vcvt.f32.s32 %v732_v39 }
 0x219   :  { %v735_v44 = vcvt.f32.s32 %v734_v42  ;;  %v629_v45 = vcombine.low %v729_v40, %v731_v41 }
 0x21b   :  { %v630_v46 = vcombine.low %v733_v43, %v735_v44  ;;  %v637_v5 = vrot.slane %v629_v45, %v636_v34 }
 0x21d   :  { %v644_v47 = vrot.slane %v630_v46, %v636_v34 }
 0x21f   :  { %v645_v48 = vcombine.low %v637_v5, %v644_v47 }
 0x221   :  { %v652_v49 = vrot.slane %v645_v48, %v636_v34 }
 0x223   :  { %657 = vst.msk [vmem:[#allocation4] sm:$0xf] %vm655_vm2, %v652_v49 }
 0x224   :  { %792 = shalt.err (!%p789_p12)
}
 0x225   :  { %s793_s17 = scalar_lea.hbm %s1033_s7, 64 }
 0x226   :  { %p794_p13 = scmp.ne.s32.totalorder %s1033_s7, %s793_s17  ;;  %p797_p0 = scmp.lt.u32.totalorder %s793_s17, %s1033_s7 }
 0x228   :  { %p799_p1 = pnand %p797_p0, %p794_p13 }
 0x22a   :  { %802 = shalt.err (!%p799_p1)
}
 0x22b   :  { %677 = dma.vmem_to_hbm [thread:$0]  %s675_s13, 64, %s1033_s7, [#allocation5]  }
 0x22c   :  { %803 = dma.done.wait [#allocation3], 512  }
 0x22d   :  { %804 = vsyncadd [#allocation3], 4294966784 }
 0x22e   :  { %805 = dma.done.wait [#allocation5], 64  }
 0x22f   :  { %806 = vsyncadd [#allocation5], 4294967232 }
 0x230   :  { %684 = vsyncpa [#allocation3], 1 }
 0x231   :  { %685 = vsyncpa [#allocation5], 1 }

</bundles_post_ra>
